<compile_context>
chip_gen: v5e
topology: v5e:2x2
jax: 0.10.0
libtpu: 0.0.40
codegen_flags: <defaults>
</compile_context>

<pallas_src>
import functools

import jax
import jax.numpy as jnp
from jax import lax
from jax.experimental import pallas as pl
from jax.experimental.pallas import tpu as pltpu

D_DECAY_LORA = 64
D_AAA_LORA = 64
D_MV_LORA = 32
D_GATE_LORA = 128


# ----------------------------- matmul kernel --------------------------------
def _matmul_kernel(x_ref, w_ref, o_ref, acc_ref):
    @pl.when(pl.program_id(2) == 0)
    def _():
        acc_ref[...] = jnp.zeros_like(acc_ref)

    acc_ref[...] += jnp.dot(
        x_ref[...], w_ref[...], preferred_element_type=jnp.float32)

    @pl.when(pl.program_id(2) == pl.num_programs(2) - 1)
    def _():
        o_ref[...] = acc_ref[...].astype(o_ref.dtype)


def _pick_tile(dim, target, align):
    """Largest tile <= target that divides dim and respects alignment,
    falling back to the full dimension (always legal for BlockSpec)."""
    if dim <= target:
        return dim
    t = (target // align) * align
    while t >= align:
        if dim % t == 0:
            return t
        t -= align
    return dim


def pallas_matmul(x, w, *, tm=256, tn=256, tk=512):
    """x: (M, K), w: (K, N) -> (M, N) float32, tiled with K accumulation."""
    M, K = x.shape
    K2, N = w.shape
    assert K == K2
    tm = _pick_tile(M, tm, 8)
    tn = _pick_tile(N, tn, 128)
    tk = _pick_tile(K, tk, 128)
    grid = (M // tm, N // tn, K // tk)
    return pl.pallas_call(
        _matmul_kernel,
        out_shape=jax.ShapeDtypeStruct((M, N), jnp.float32),
        grid_spec=pltpu.PrefetchScalarGridSpec(
            num_scalar_prefetch=0,
            grid=grid,
            in_specs=[
                pl.BlockSpec((tm, tk), lambda i, j, k: (i, k)),
                pl.BlockSpec((tk, tn), lambda i, j, k: (k, j)),
            ],
            out_specs=pl.BlockSpec((tm, tn), lambda i, j, k: (i, j)),
            scratch_shapes=[pltpu.VMEM((tm, tn), jnp.float32)],
        ),
        compiler_params=pltpu.CompilerParams(
            dimension_semantics=("parallel", "parallel", "arbitrary")),
    )(x, w)


# ------------------------------ WKV7 kernel ---------------------------------
def _wkv7_kernel(r_ref, k_ref, v_ref, w_ref, a_ref, b_ref, s0_ref,
                 lnw_ref, lnb_ref, rk_ref,
                 y_ref, sout_ref,
                 o_scr, d_scr, *, eps):
    # r/k/v/w/a/b refs: (Tc, N) time-chunk for one (batch, head);
    # s0/sout refs: (N, N) state [value, key]; lnw/lnb/rk: (1, N) per head.
    Tc = r_ref.shape[0]
    tc = pl.program_id(2)

    # State carry: the resident state-output block doubles as the accumulator.
    @pl.when(tc == 0)
    def _():
        sout_ref[...] = s0_ref[...]

    # Hoisted transcendental: RWKV7 decay = exp(-exp(w)) for the whole tile.
    d_scr[...] = jnp.exp(-jnp.exp(w_ref[...]))

    def step(t, S):
        r_t = r_ref[pl.ds(t, 1), :]        # (1, N)
        k_t = k_ref[pl.ds(t, 1), :]
        v_t = v_ref[pl.ds(t, 1), :]
        a_t = a_ref[pl.ds(t, 1), :]
        b_t = b_ref[pl.ds(t, 1), :]
        d_t = d_scr[pl.ds(t, 1), :]        # pre-computed decay row

        # serial part: sa reduction + state update (S carried in registers)
        sa = jnp.sum(S * a_t, axis=1, keepdims=True)          # (N, 1) = S @ a
        S = S * d_t + sa * b_t + jnp.transpose(v_t) * k_t     # (N, N)

        # off-chain: stage raw output row; GroupNorm/bonus applied after loop
        o_col = jnp.sum(S * r_t, axis=1, keepdims=True)       # (N, 1) = S @ r
        o_scr[pl.ds(t, 1), :] = jnp.transpose(o_col)
        return S

    unroll = 4 if Tc % 4 == 0 else 1
    s_final = lax.fori_loop(0, Tc, step, sout_ref[...], unroll=unroll)
    sout_ref[...] = s_final

    # Hoisted per-head GroupNorm (one group per head) + bonus, one dense pass.
    o = o_scr[...]                                            # (Tc, N)
    mean = jnp.mean(o, axis=-1, keepdims=True)
    cen = o - mean
    var = jnp.mean(cen * cen, axis=-1, keepdims=True)
    o_n = cen * lax.rsqrt(var + eps) * lnw_ref[...] + lnb_ref[...]

    bonus = jnp.sum(r_ref[...] * k_ref[...] * rk_ref[...], axis=-1,
                    keepdims=True) * v_ref[...]
    y_ref[...] = (o_n + bonus).astype(y_ref.dtype)


def _pick_chunk(T, target=256):
    if T <= target:
        return T
    t = (target // 8) * 8
    while t >= 8:
        if T % t == 0:
            return t
        t -= 8
    return T


def wkv7_pallas(r, k, v, w, a, b, s0, ln_w, ln_b, r_k, eps, *, chunk_t=256):
    """r,k,v,w,a,b: (B, H, T, N); s0: (B, H, N, N); ln_w/ln_b/r_k: (H, 1, N).
    Returns (y (B,H,T,N), final state (B,H,N,N))."""
    B, H, T, N = r.shape
    Tc = _pick_chunk(T, chunk_t)      # caps VMEM (important on v7x's 64 MiB)
    nc = T // Tc
    kernel = functools.partial(_wkv7_kernel, eps=eps)

    seq_spec = pl.BlockSpec((None, None, Tc, N),
                            lambda bi, hi, ti: (bi, hi, ti, 0))
    state_spec = pl.BlockSpec((None, None, N, N),
                              lambda bi, hi, ti: (bi, hi, 0, 0))
    vec_spec = pl.BlockSpec((None, 1, N), lambda bi, hi, ti: (hi, 0, 0))

    y, s_out = pl.pallas_call(
        kernel,
        out_shape=(
            jax.ShapeDtypeStruct((B, H, T, N), jnp.float32),
            jax.ShapeDtypeStruct((B, H, N, N), jnp.float32),
        ),
        grid_spec=pltpu.PrefetchScalarGridSpec(
            num_scalar_prefetch=0,
            grid=(B, H, nc),
            in_specs=[seq_spec, seq_spec, seq_spec,      # r, k, v
                      seq_spec, seq_spec, seq_spec,      # w, a, b
                      state_spec,                        # s0
                      vec_spec, vec_spec, vec_spec],     # ln_w, ln_b, r_k
            out_specs=[seq_spec, state_spec],
            scratch_shapes=[pltpu.VMEM((Tc, N), jnp.float32),   # staged raw o
                            pltpu.VMEM((Tc, N), jnp.float32)],  # hoisted decay
        ),
        compiler_params=pltpu.CompilerParams(
            dimension_semantics=("parallel", "parallel", "arbitrary")),
    )(r, k, v, w, a, b, s0, ln_w, ln_b, r_k)
    return y, s_out


# ------------------------------ forward glue --------------------------------
def rwkv_tmix_x070_forward(params, x, shift_state, wkv_state, v_first, *,
                           layer_id, n_head, head_size, eps):
    B, T, C = x.shape
    H, N = n_head, head_size
    assert C == H * N

    # time shift: xx = concat(shift_state, x[:, :-1]) - x
    xprev = jnp.concatenate([shift_state[:, None, :], x[:, :-1]], axis=1)
    xx = xprev - x
    lx = x[:, -1]

    xr = x + xx * params["x_r"]
    xw = x + xx * params["x_w"]
    xk = x + xx * params["x_k"]
    xv = x + xx * params["x_v"]
    xa = x + xx * params["x_a"]
    xg = x + xx * params["x_g"]

    def mm(y2d, wmat):
        return pallas_matmul(y2d, wmat)

    def lin(y, wmat):
        # weights stored (in, out); equivalent to torch nn.Linear with weight w.T
        return mm(y.reshape(B * T, C), wmat).reshape(B, T, -1)

    r = lin(xr, params["W_r"])
    k = lin(xk, params["W_k"])
    v = lin(xv, params["W_v"])

    # w = -softplus(-(w0 + tanh(xw @ w1) @ w2)) - 0.5   (log-log decay; the
    # WKV kernel applies the RWKV7 convention decay = exp(-exp(w)))
    w_lora = mm(jnp.tanh(mm(xw.reshape(B * T, C), params["w1"])), params["w2"])
    w = -jax.nn.softplus(-(params["w0"] + w_lora.reshape(B, T, C))) - 0.5

    if layer_id == 0:
        v_first = v                                   # update_v_first(v)
    else:
        v_lora = mm(mm(xv.reshape(B * T, C), params["v1"]),
                    params["v2"]).reshape(B, T, C)
        v = v + (v_first - v) * jax.nn.sigmoid(params["v0"] + v_lora)

    a_lora = mm(mm(xa.reshape(B * T, C), params["a1"]),
                params["a2"]).reshape(B, T, C)
    a = jax.nn.sigmoid(params["a0"] + a_lora)

    # gate (wkv_has_gate = True)
    g = mm(jax.nn.sigmoid(mm(xg.reshape(B * T, C), params["g1"])),
           params["g2"]).reshape(B, T, C)

    kk = k * params["k_k"]
    kk = kk.reshape(B, T, H, N)
    kk = kk / jnp.maximum(
        jnp.sqrt(jnp.sum(kk * kk, axis=-1, keepdims=True)), 1e-12)
    kk = kk.reshape(B, T, C)
    k = k * (1.0 + (a - 1.0) * params["k_a"])

    # TODO(synk): drop these HBM transposes by teaching the WKV BlockSpecs to
    # slice heads from (B, T, H, N) directly (needs head-packed lane blocks).
    def to_bhtn(z):
        return z.reshape(B, T, H, N).transpose(0, 2, 1, 3)

    y, wkv_state_new = wkv7_pallas(
        to_bhtn(r), to_bhtn(k), to_bhtn(v), to_bhtn(w),
        to_bhtn(-kk), to_bhtn(kk * a), wkv_state,
        params["ln_w"].reshape(H, 1, N),
        params["ln_b"].reshape(H, 1, N),
        params["r_k"].reshape(H, 1, N),
        eps,
    )

    # y already contains GroupNorm(x) + (r*k*r_k).sum * v bonus per head
    x_attn = y.transpose(0, 2, 1, 3).reshape(B, T, C)
    out = lin(x_attn * g, params["W_o"])
    return out, lx, wkv_state_new, v_first


# ------------------------------ param init ----------------------------------
def init_params(key, C, H, N):
    # Deterministic synthetic initialization (shapes from the module __init__).
    names_shapes = [
        ("x_r", (1, 1, C)), ("x_w", (1, 1, C)), ("x_k", (1, 1, C)),
        ("x_v", (1, 1, C)), ("x_a", (1, 1, C)), ("x_g", (1, 1, C)),
        ("w0", (1, 1, C)), ("w1", (C, D_DECAY_LORA)), ("w2", (D_DECAY_LORA, C)),
        ("a0", (1, 1, C)), ("a1", (C, D_AAA_LORA)), ("a2", (D_AAA_LORA, C)),
        ("v0", (1, 1, C)), ("v1", (C, D_MV_LORA)), ("v2", (D_MV_LORA, C)),
        ("g1", (C, D_GATE_LORA)), ("g2", (D_GATE_LORA, C)),
        ("k_k", (1, 1, C)), ("k_a", (1, 1, C)), ("r_k", (H, N)),
        ("W_r", (C, C)), ("W_k", (C, C)), ("W_v", (C, C)), ("W_o", (C, C)),
        ("ln_w", (C,)), ("ln_b", (C,)),
    ]
    keys = jax.random.split(key, len(names_shapes))
    params = {}
    for (name, shape), kk in zip(names_shapes, keys):
        params[name] = 0.1 * jax.random.normal(kk, shape, dtype=jnp.float32)
    # nudge a few params toward their nominal post_init values
    params["k_k"] = params["k_k"] + 0.85
    params["k_a"] = params["k_a"] + 1.0
    params["v0"] = params["v0"] + 1.0
    params["ln_w"] = params["ln_w"] + 1.0
    return params


if __name__ == "__main__":
    B, T, C = 2, 8, 32
    H, N = 2, 16                      # num_wkv_heads, head_size
    head_size_divisor = 8
    eps = 1e-05 * head_size_divisor ** 2
    layer_id = 1                      # exercise the v_first mixing branch

    key = jax.random.PRNGKey(0)
    kp, kx, ks, kv = jax.random.split(key, 4)
    params = init_params(kp, C, H, N)

    x = jax.random.normal(kx, (B, T, C), dtype=jnp.float32)
    shift_state = jax.random.normal(ks, (B, C), dtype=jnp.float32)
    v_first = jax.random.normal(kv, (B, T, C), dtype=jnp.float32)
    wkv_state = jnp.zeros((B, H, N, N), dtype=jnp.float32)

    out, lx, new_wkv_state, v_first_out = rwkv_tmix_x070_forward(
        params, x, shift_state, wkv_state, v_first,
        layer_id=layer_id, n_head=H, head_size=N, eps=eps)

    jax.block_until_ready((out, lx, new_wkv_state, v_first_out))
    assert out.shape == (B, T, C)
    assert lx.shape == (B, C)
    assert new_wkv_state.shape == (B, H, N, N)
    assert v_first_out.shape == (B, T, C)
    print("KERNEL_OK")
</pallas_src>

<mosaic_0001>
module attributes {stable_mosaic.version = 11 : i64} {
  func.func @_matmul_kernel(%arg0: i32, %arg1: i32, %arg2: i32, %arg3: memref<16x32xf32, #tpu.memory_space<vmem>>, %arg4: memref<32x32xf32, #tpu.memory_space<vmem>>, %arg5: memref<16x32xf32, #tpu.memory_space<vmem>>, %arg6: memref<16x32xf32, #tpu.memory_space<vmem>>) attributes {dimension_semantics = [#tpu.dimension_semantics<parallel>, #tpu.dimension_semantics<parallel>, #tpu.dimension_semantics<arbitrary>], iteration_bounds = array<i64: 1, 1, 1>, scalar_prefetch = 0 : i64, scratch_operands = 1 : i64, tpu.core_type = #tpu.core_type<tc>, window_params = [{transform_indices = @transform_0, window_bounds = array<i64: 16, 32>}, {transform_indices = @transform_1, window_bounds = array<i64: 32, 32>}, {transform_indices = @transform_2, window_bounds = array<i64: 16, 32>}]} {
    %c0_i32 = arith.constant 0 : i32
    %0 = arith.cmpi eq, %arg2, %c0_i32 : i32
    %1 = arith.extui %0 : i1 to i32
    %c0_i32_0 = arith.constant 0 : i32
    %2 = arith.cmpi ne, %1, %c0_i32_0 : i32
    scf.if %2 {
      %cst_10 = arith.constant 0.000000e+00 : f32
      %12 = vector.broadcast %cst_10 : f32 to vector<16x32xf32>
      %c0_11 = arith.constant 0 : index
      %c0_12 = arith.constant 0 : index
      %13 = vector.load %arg6[%c0_11, %c0_12] : memref<16x32xf32, #tpu.memory_space<vmem>>, vector<16x32xf32>
      tpu.vector_store %arg6[%c0_11, %c0_12], %12 {strides = array<i32>} : memref<16x32xf32, #tpu.memory_space<vmem>>, vector<16x32xf32>,
    } else {
    }
    %c0 = arith.constant 0 : index
    %c0_1 = arith.constant 0 : index
    %3 = vector.load %arg6[%c0, %c0_1] : memref<16x32xf32, #tpu.memory_space<vmem>>, vector<16x32xf32>
    %c0_2 = arith.constant 0 : index
    %c0_3 = arith.constant 0 : index
    %4 = vector.load %arg3[%c0_2, %c0_3] : memref<16x32xf32, #tpu.memory_space<vmem>>, vector<16x32xf32>
    %c0_4 = arith.constant 0 : index
    %c0_5 = arith.constant 0 : index
    %5 = vector.load %arg4[%c0_4, %c0_5] : memref<32x32xf32, #tpu.memory_space<vmem>>, vector<32x32xf32>
    %cst = arith.constant dense<0.000000e+00> : vector<16x32xf32>
    %6 = tpu.matmul %4, %5, %cst {dimension_numbers = #tpu.dot_dimension_numbers<[1], [0], [0], [1], [0, 0, 1, 1], [], []>} : vector<16x32xf32>, vector<32x32xf32>, vector<16x32xf32> -> vector<16x32xf32>
    %7 = arith.addf %3, %6 : vector<16x32xf32>
    %c0_6 = arith.constant 0 : index
    %c0_7 = arith.constant 0 : index
    %8 = vector.load %arg6[%c0_6, %c0_7] : memref<16x32xf32, #tpu.memory_space<vmem>>, vector<16x32xf32>
    tpu.vector_store %arg6[%c0_6, %c0_7], %7 {strides = array<i32>} : memref<16x32xf32, #tpu.memory_space<vmem>>, vector<16x32xf32>,
    %c0_i32_8 = arith.constant 0 : i32
    %9 = arith.cmpi eq, %arg2, %c0_i32_8 : i32
    %10 = arith.extui %9 : i1 to i32
    %c0_i32_9 = arith.constant 0 : i32
    %11 = arith.cmpi ne, %10, %c0_i32_9 : i32
    scf.if %11 {
      %c0_10 = arith.constant 0 : index
      %c0_11 = arith.constant 0 : index
      %12 = vector.load %arg6[%c0_10, %c0_11] : memref<16x32xf32, #tpu.memory_space<vmem>>, vector<16x32xf32>
      %c0_12 = arith.constant 0 : index
      %c0_13 = arith.constant 0 : index
      %13 = vector.load %arg5[%c0_12, %c0_13] : memref<16x32xf32, #tpu.memory_space<vmem>>, vector<16x32xf32>
      tpu.vector_store %arg5[%c0_12, %c0_13], %12 {strides = array<i32>} : memref<16x32xf32, #tpu.memory_space<vmem>>, vector<16x32xf32>,
    } else {
    }
    return
  }
  func.func @transform_0(%arg0: i32, %arg1: i32, %arg2: i32) -> (i32, i32) {
    %c0_i32 = arith.constant 0 : i32
    return %arg0, %arg2 : i32, i32
  }
  func.func @transform_1(%arg0: i32, %arg1: i32, %arg2: i32) -> (i32, i32) {
    %c0_i32 = arith.constant 0 : i32
    return %arg2, %arg1 : i32, i32
  }
  func.func @transform_2(%arg0: i32, %arg1: i32, %arg2: i32) -> (i32, i32) {
    %c0_i32 = arith.constant 0 : i32
    return %arg0, %arg1 : i32, i32
  }
}

</mosaic_0001>

<bundles_post_ra>
// kernel: tpu_custom_call.1
= control target key start
LH: loop header
LB: loop body
LE: loop exit
PB: predicated region body
PF: predicated region fallthrough
CT: control target
= control target key end

     0   :  { %7 = vsyncpa [#allocation4], 0  ;;  %s257_s0 = inlined_call_operand.hbm [shape: f32[16,32], index: 0, kind: input, shape index: {}]   ;;  %s258_s1 = inlined_call_operand.hbm [shape: f32[32,32], index: 1, kind: input, shape index: {}]   ;;  %s259_s2 = inlined_call_operand.hbm [shape: f32[16,32], index: 2, kind: output, shape index: {}]  }
   0x1   :  { %8 = vsyncpa [#allocation7], 0 }
   0x2   :  { %9 = vsyncpa [#allocation5], 0  ;;  %s14_s11 = sshll.u32 %s257_s0, 4  ;;  %s210_s12 = smov [#allocation3]   ;;  %s15_s11 = int_to_ptr.hbm [resolvable:$true] %s14_s11 }
   0x3   :  { %s16_s13 = sshll.u32 %s210_s12, 4  ;;  %s27_s16 = sshll.u32 %s258_s1, 4  ;;  %s17_s13 = int_to_ptr.vmem [resolvable:$true] %s16_s13  ;;  %s28_s16 = int_to_ptr.hbm [resolvable:$true] %s27_s16 }
   0x4   :  { %s211_s17 = smov 128   ;;  %s212_s18 = smov 8  }
   0x5   :  { %22 = dma.hbm_to_vmem [thread:$0]  %s15_s11, 256, %s17_s13, [#allocation4], %s211_s17, %s211_s17, %s212_s18  }
   0x6   :  { %s213_s19 = smov [#allocation6]  }
   0x7   :  { %s29_s20 = sshll.u32 %s213_s19, 4  ;;  %s30_s20 = int_to_ptr.vmem [resolvable:$true] %s29_s20 }
   0x8   :  { %35 = dma.hbm_to_vmem [thread:$0]  %s28_s16, 512, %s30_s20, [#allocation7], %s211_s17, %s211_s17, %s212_s18  }
   0x9   :  { %204 = dma.done.wait [#allocation4], 256  }
   0xa   :  { %205 = vsyncadd [#allocation4], 4294967040 }
   0xb   :  { %206 = dma.done.wait [#allocation7], 512  }
   0xc   :  { %207 = vsyncadd [#allocation7], 4294966784  ;;  %vm48_vm0 = vcmask 261120   ;;  %v214_v0 = vmov 0.0   ;;  %v58_v1 = vld [vmem:[#allocation6 + $0x18] sm:$0xff]  ;;  %v57_v2 = vld [vmem:[#allocation6 + $0x10] sm:$0xff] }
   0xd   :  { %49 = vst.msk [vmem:[#allocation2] sm:$0xff] %vm48_vm0, %v214_v0  ;;  %78 = vmatpush.msra.mxu0 %v58_v1  ;;  %122 = vmatpush.msra.mxu1 %v58_v1  ;;  %v56_v3 = vld [vmem:[#allocation6 + $0x8] sm:$0xff]  ;;  %v55_v4 = vld [vmem:[#allocation6] sm:$0xff]  ;;  %v53_v5 = vld [vmem:[#allocation3] sm:$0xff]  ;;  %s215_s0 = smov [#allocation8]   ;;  %s106_s23 = sshll.u32 %s259_s2, 4  ;;  %s107_s23 = int_to_ptr.hbm [resolvable:$true] %s106_s23 }
   0xe   :  { %50 = vst.msk [vmem:[#allocation2 + $0x8] sm:$0xff] %vm48_vm0, %v214_v0  ;;  %v54_v6 = vld [vmem:[#allocation3 + $0x8] sm:$0xff]  ;;  %s104_s1 = sshll.u32 %s215_s0, 4  ;;  %s105_s1 = int_to_ptr.vmem [resolvable:$true] %s104_s1 }
   0xf   :  { %79 = vmatpush.msra.mxu0 %v57_v2  ;;  %123 = vmatpush.msra.mxu1 %v57_v2 }
  0x11   :  { %80 = vmatpush.msra.mxu0 %v56_v3  ;;  %124 = vmatpush.msra.mxu1 %v56_v3 }
  0x13   :  { %81 = vmatpush.msra.mxu0 %v55_v4  ;;  %125 = vmatpush.msra.mxu1 %v55_v4 }
  0x14   :  { %120 = vmatmul.msk.f32.vlgmr.msra.gmra.mxu0 %vm48_vm0, %v53_v5  ;;  %121 = vmatmul.msk.f32.vlgmr.msra.gmra.mxu1 %vm48_vm0, %v54_v6  ;;  %v51_v7 = vld [vmem:[#allocation2] sm:$0xff] }
  0x15   :  { %v52_v8 = vld [vmem:[#allocation2 + $0x8] sm:$0xff] }
  0x91   :  { %v83_v9 = vpop.f32.mrf.mxu0  ;;  %v86_v10 = vpop.f32.mrf.mxu1 }
  0x92   :  { %v89_v11 = vadd.f32 %v83_v9, %v51_v7  ;;  %v90_v12 = vadd.f32 %v86_v10, %v52_v8 }
  0x94   :  { %91 = vst.msk [vmem:[#allocation2] sm:$0xff] %vm48_vm0, %v89_v11 }
  0x95   :  { %92 = vst.msk [vmem:[#allocation2 + $0x8] sm:$0xff] %vm48_vm0, %v90_v12 }
  0x9b   :  { %v96_v13 = vld [vmem:[#allocation2] sm:$0xff] }
  0x9c   :  { %v97_v14 = vld [vmem:[#allocation2 + $0x8] sm:$0xff]  ;;  %98 = vst.msk [vmem:[#allocation8] sm:$0xff] %vm48_vm0, %v96_v13 }
  0x9d   :  { %99 = vst.msk [vmem:[#allocation8 + $0x8] sm:$0xff] %vm48_vm0, %v97_v14 }
  0x9e   :  { %112 = dma.vmem_to_hbm [thread:$0]  %s105_s1, 256, %s107_s23, [#allocation5], %s211_s17, %s211_s17, %s212_s18  }
  0x9f   :  { %208 = dma.done.wait [#allocation5], 256  }
  0xa0   :  { %209 = vsyncadd [#allocation5], 4294967040 }
  0xa1   :  { %117 = vsyncpa [#allocation4], 1 }
  0xa2   :  { %118 = vsyncpa [#allocation7], 1 }
  0xa3   :  { %119 = vsyncpa [#allocation5], 1 }

</bundles_post_ra>
